<compile_context>
chip_gen: v7x
topology: tpu7x:2x2x1
jax: 0.10.0
libtpu: 0.0.40
codegen_flags: <defaults>
</compile_context>

<pallas_src>
import functools

import jax
import jax.numpy as jnp
from jax.experimental import pallas as pl
from jax.experimental.pallas import tpu as pltpu

EPS = 1e-5
# Above the 16 MiB v5e default scoped limit, <= physical VMEM on v5e/v6e/v7x.
VMEM_LIMIT = 32 * 1024 * 1024


# ------------------------------ tile helpers --------------------------------

def _row_tile(m):
    # Prefer large row tiles (512-1024 rows) for streaming kernels; fall back
    # to the full extent (block == full dim is always legal).
    for t in (1024, 512, 256, 128, 64, 32, 16, 8):
        if m % t == 0:
            return t
    return m


def _lane_tile(n):
    # Lane/contraction tiles: multiple of 128 or the full extent.
    for t in (512, 256, 128):
        if n % t == 0:
            return t
    return n


# ----------------------------- Pallas kernels -------------------------------

def _mm_bnrelu_stats_kernel(prologue, x_ref, scale_ref, bias_ref, w_ref,
                            y_ref, psum_ref, psq_ref, acc_ref):
    """Tiled matmul with optional BN+ReLU LHS prologue and BN-stats epilogue.

    grid = (M//tm, N//tn, K//tk); K is the (last, "arbitrary") reduction axis.
    Outputs: y (pre-BN conv result, bf16) and per-row-tile partial column sums
    and sums-of-squares (f32) for the *next* BatchNorm.
    """
    kk = pl.program_id(2)

    @pl.when(kk == 0)
    def _():
        acc_ref[...] = jnp.zeros_like(acc_ref)

    x = x_ref[...].astype(jnp.float32)
    if prologue:  # fuse BN+ReLU of the previous conv into this matmul's LHS
        x = jnp.maximum(x * scale_ref[...] + bias_ref[...], 0.0)
    acc_ref[...] += jnp.dot(x.astype(jnp.bfloat16), w_ref[...],
                            preferred_element_type=jnp.float32)

    @pl.when(kk == pl.num_programs(2) - 1)
    def _():
        acc = acc_ref[...]
        y_ref[...] = acc.astype(y_ref.dtype)
        psum_ref[...] = jnp.sum(acc, axis=0, keepdims=True)[None]
        psq_ref[...] = jnp.sum(acc * acc, axis=0, keepdims=True)[None]


def _conv3x3_bnrelu_stats_kernel(H, W, HO, WO, STRIDE,
                                 x_ref, scale_ref, bias_ref, w_ref,
                                 y_ref, psum_ref, psq_ref, pad_ref):
    """3x3 conv (pad=1) done fully in-kernel for one image.

    Prologue: BN+ReLU of the previous conv applied to the input tile.
    Body: 9-tap accumulation from a zero-padded VMEM scratch (no HBM im2col).
    Epilogue: per-image partial BN stats of the conv output.
    """
    cin = x_ref.shape[-1]
    cout = w_ref.shape[-1]

    # BN1 + ReLU prologue (f32 math), then stage into zero-padded bf16 scratch.
    a = jnp.maximum(x_ref[...].astype(jnp.float32) * scale_ref[...]
                    + bias_ref[...], 0.0)
    pad_ref[...] = jnp.zeros_like(pad_ref)
    pad_ref[:, 1:H + 1, 1:W + 1, :] = a.astype(pad_ref.dtype)

    xp = pad_ref[...]          # (1, H+2, W+2, Cin) bf16
    wv = w_ref[...]            # (3, 3, Cin, Cout)  bf16

    acc = jnp.zeros((HO * WO, cout), jnp.float32)
    for ky in range(3):
        for kx in range(3):
            win = xp[0,
                     ky:ky + (HO - 1) * STRIDE + 1:STRIDE,
                     kx:kx + (WO - 1) * STRIDE + 1:STRIDE, :]
            acc = acc + jnp.dot(win.reshape(HO * WO, cin), wv[ky, kx],
                                preferred_element_type=jnp.float32)

    y_ref[...] = acc.reshape(1, HO, WO, cout).astype(y_ref.dtype)
    psum_ref[...] = jnp.sum(acc, axis=0, keepdims=True)[None]
    psq_ref[...] = jnp.sum(acc * acc, axis=0, keepdims=True)[None]


def _bn_add_relu_kernel(x_ref, scale_ref, bias_ref, res_ref, o_ref):
    y = (x_ref[...].astype(jnp.float32) * scale_ref[...] + bias_ref[...]
         + res_ref[...])
    o_ref[...] = jnp.maximum(y, 0.0)


# --------------------------- pallas_call wrappers ----------------------------

def fused_matmul_stats(x, w, *, prologue, scale=None, bias=None):
    """y = relu(x*scale+bias) @ w (or x @ w) plus fused per-tile BN stats."""
    m, k = x.shape
    n = w.shape[1]
    if scale is None:
        scale = jnp.ones((1, k), jnp.float32)
        bias = jnp.zeros((1, k), jnp.float32)
    tm, tn, tk = _row_tile(m), _lane_tile(n), _lane_tile(k)
    gm, gn, gk = m // tm, n // tn, k // tk

    kernel = functools.partial(_mm_bnrelu_stats_kernel, prologue)
    y, psum, psq = pl.pallas_call(
        kernel,
        out_shape=(jax.ShapeDtypeStruct((m, n), jnp.bfloat16),
                   jax.ShapeDtypeStruct((gm, 1, n), jnp.float32),
                   jax.ShapeDtypeStruct((gm, 1, n), jnp.float32)),
        grid=(gm, gn, gk),
        in_specs=[pl.BlockSpec((tm, tk), lambda i, j, kk: (i, kk)),
                  pl.BlockSpec((1, tk), lambda i, j, kk: (0, kk)),
                  pl.BlockSpec((1, tk), lambda i, j, kk: (0, kk)),
                  pl.BlockSpec((tk, tn), lambda i, j, kk: (kk, j))],
        out_specs=(pl.BlockSpec((tm, tn), lambda i, j, kk: (i, j)),
                   pl.BlockSpec((1, 1, tn), lambda i, j, kk: (i, 0, j)),
                   pl.BlockSpec((1, 1, tn), lambda i, j, kk: (i, 0, j))),
        scratch_shapes=[pltpu.VMEM((tm, tn), jnp.float32)],
        compiler_params=pltpu.CompilerParams(
            dimension_semantics=("parallel", "parallel", "arbitrary"),
            vmem_limit_bytes=VMEM_LIMIT),
    )(x, scale, bias, w)
    return y, psum, psq


def conv3x3_fused(x_nhwc, scale, bias, w_hwio, stride):
    n, h, w, cin = x_nhwc.shape
    cout = w_hwio.shape[-1]
    ho = (h + 2 - 3) // stride + 1
    wo = (w + 2 - 3) // stride + 1

    kernel = functools.partial(_conv3x3_bnrelu_stats_kernel, h, w, ho, wo,
                               stride)
    y, psum, psq = pl.pallas_call(
        kernel,
        out_shape=(jax.ShapeDtypeStruct((n, ho, wo, cout), jnp.bfloat16),
                   jax.ShapeDtypeStruct((n, 1, cout), jnp.float32),
                   jax.ShapeDtypeStruct((n, 1, cout), jnp.float32)),
        grid=(n,),
        in_specs=[pl.BlockSpec((1, h, w, cin), lambda b: (b, 0, 0, 0)),
                  pl.BlockSpec((1, cin), lambda b: (0, 0)),
                  pl.BlockSpec((1, cin), lambda b: (0, 0)),
                  pl.BlockSpec((3, 3, cin, cout), lambda b: (0, 0, 0, 0))],
        out_specs=(pl.BlockSpec((1, ho, wo, cout), lambda b: (b, 0, 0, 0)),
                   pl.BlockSpec((1, 1, cout), lambda b: (b, 0, 0)),
                   pl.BlockSpec((1, 1, cout), lambda b: (b, 0, 0))),
        scratch_shapes=[pltpu.VMEM((1, h + 2, w + 2, cin), jnp.bfloat16)],
        compiler_params=pltpu.CompilerParams(
            dimension_semantics=("parallel",),
            vmem_limit_bytes=VMEM_LIMIT),
    )(x_nhwc, scale, bias, w_hwio)
    return y, psum, psq, ho, wo


def bn_add_relu(x, scale, bias, res):
    m, c = x.shape
    tm = _row_tile(m)
    return pl.pallas_call(
        _bn_add_relu_kernel,
        out_shape=jax.ShapeDtypeStruct((m, c), jnp.float32),
        grid=(m // tm,),
        in_specs=[pl.BlockSpec((tm, c), lambda i: (i, 0)),
                  pl.BlockSpec((1, c), lambda i: (0, 0)),
                  pl.BlockSpec((1, c), lambda i: (0, 0)),
                  pl.BlockSpec((tm, c), lambda i: (i, 0))],
        out_specs=pl.BlockSpec((tm, c), lambda i: (i, 0)),
        compiler_params=pltpu.CompilerParams(
            dimension_semantics=("parallel",),
            vmem_limit_bytes=VMEM_LIMIT),
    )(x, scale, bias, res)


# ------------------------------ glue helpers ---------------------------------

def _scale_bias_from_stats(psum, psq, count, gamma, beta):
    # Tiny (tiles, 1, C) partial sums -> BN scale/bias in plain JAX.
    s = jnp.sum(psum, axis=0)                 # (1, C)
    sq = jnp.sum(psq, axis=0)                 # (1, C)
    mean = s / count
    var = sq / count - mean * mean            # biased variance (BN training)
    scale = gamma[None, :] * jax.lax.rsqrt(var + EPS)
    bias = beta[None, :] - mean * scale
    return scale.astype(jnp.float32), bias.astype(jnp.float32)


# ------------------------------ Bottleneck -----------------------------------

def bottleneck_forward(x_nchw, params, stride=1):
    """Bottleneck forward (downsample=None), PyTorch-equivalent semantics."""
    x = jnp.transpose(x_nchw, (0, 2, 3, 1)).astype(jnp.float32)  # NCHW -> NHWC
    n, h, w, cin = x.shape
    planes = params["w1"].shape[0]
    cout = params["w3"].shape[0]
    # downsample=None => residual add requires stride==1 and Cin==Cout.
    assert stride == 1 and cin == cout, \
        "downsample=None requires stride==1 and inplanes == planes*4"

    x2d = x.reshape(n * h * w, cin)

    # Pre-transposed bf16 weights (MXU operands).
    w1 = jnp.transpose(params["w1"].reshape(planes, cin)).astype(jnp.bfloat16)
    w2 = jnp.transpose(params["w2"], (2, 3, 1, 0)).astype(jnp.bfloat16)  # HWIO
    w3 = jnp.transpose(params["w3"].reshape(cout, planes)).astype(jnp.bfloat16)

    # conv1 (1x1) + fused BN1 stats.
    y1, s1, q1 = fused_matmul_stats(x2d, w1, prologue=False)
    scale1, bias1 = _scale_bias_from_stats(s1, q1, n * h * w,
                                           params["g1"], params["b1"])

    # conv2 (3x3, pad=1) with BN1+ReLU prologue + fused BN2 stats (no im2col).
    y1_nhwc = y1.reshape(n, h, w, planes)
    y2, s2, q2, ho, wo = conv3x3_fused(y1_nhwc, scale1, bias1, w2, stride)
    scale2, bias2 = _scale_bias_from_stats(s2, q2, n * ho * wo,
                                           params["g2"], params["b2"])

    # conv3 (1x1) with BN2+ReLU prologue + fused BN3 stats.
    y2_2d = y2.reshape(n * ho * wo, planes)
    y3, s3, q3 = fused_matmul_stats(y2_2d, w3, prologue=True,
                                    scale=scale2, bias=bias2)
    scale3, bias3 = _scale_bias_from_stats(s3, q3, n * ho * wo,
                                           params["g3"], params["b3"])

    # BN3 + residual add + ReLU (single fused elementwise pass).
    res2d = x.reshape(n * h * w, cin)
    out2d = bn_add_relu(y3, scale3, bias3, res2d)

    out = out2d.reshape(n, ho, wo, cout)
    return jnp.transpose(out, (0, 3, 1, 2))  # NHWC -> NCHW


# ------------------------------- reference -----------------------------------

def _ref_forward(x_nchw, params, stride=1):
    x = jnp.transpose(x_nchw, (0, 2, 3, 1)).astype(jnp.float32)

    def conv(inp, w_oihw, s, p):
        return jax.lax.conv_general_dilated(
            inp, jnp.transpose(w_oihw, (2, 3, 1, 0)), (s, s),
            ((p, p), (p, p)), dimension_numbers=("NHWC", "HWIO", "NHWC"))

    def bn(inp, g, b):
        mean = inp.mean(axis=(0, 1, 2))
        var = inp.var(axis=(0, 1, 2))
        return (inp - mean) * jax.lax.rsqrt(var + EPS) * g + b

    out = jax.nn.relu(bn(conv(x, params["w1"], 1, 0), params["g1"], params["b1"]))
    out = jax.nn.relu(bn(conv(out, params["w2"], stride, 1), params["g2"], params["b2"]))
    out = bn(conv(out, params["w3"], 1, 0), params["g3"], params["b3"])
    out = jax.nn.relu(out + x)
    return jnp.transpose(out, (0, 3, 1, 2))


# --------------------------------- main ---------------------------------------

def make_params(inplanes, planes, key):
    k1, k2, k3 = jax.random.split(key, 3)
    # PyTorch weight layout: OIHW; BN affine: gamma=1, beta=0.
    return {
        "w1": 0.1 * jax.random.normal(k1, (planes, inplanes, 1, 1), jnp.float32),
        "w2": 0.1 * jax.random.normal(k2, (planes, planes, 3, 3), jnp.float32),
        "w3": 0.1 * jax.random.normal(k3, (planes * 4, planes, 1, 1), jnp.float32),
        "g1": jnp.ones((planes,), jnp.float32),
        "b1": jnp.zeros((planes,), jnp.float32),
        "g2": jnp.ones((planes,), jnp.float32),
        "b2": jnp.zeros((planes,), jnp.float32),
        "g3": jnp.ones((planes * 4,), jnp.float32),
        "b3": jnp.zeros((planes * 4,), jnp.float32),
    }


if __name__ == "__main__":
    # Small but lane-friendlier shapes: batch=2, planes=32, inplanes=128
    # (= planes*4 so the residual add is legal with downsample=None),
    # spatial 8x8, stride=1.
    key = jax.random.PRNGKey(0)
    kx, kp = jax.random.split(key)
    planes = 32
    inplanes = planes * 4
    stride = 1
    x = jax.random.normal(kx, (2, inplanes, 8, 8), jnp.float32)  # NCHW
    params = make_params(inplanes, planes, kp)

    out = jax.block_until_ready(bottleneck_forward(x, params, stride=stride))
    ref = jax.block_until_ready(_ref_forward(x, params, stride=stride))

    assert out.shape == (2, inplanes, 8, 8)
    assert bool(jnp.all(jnp.isfinite(out)))
    # bf16 MXU operands + bf16 activation storage => slightly looser tolerance.
    assert bool(jnp.allclose(out, ref, rtol=5e-2, atol=7e-2)), \
        f"max abs err {float(jnp.max(jnp.abs(out - ref)))}"

    print("KERNEL_OK")
</pallas_src>

<mosaic_0001>
module attributes {stable_mosaic.version = 11 : i64} {
  func.func @_mm_bnrelu_stats_kernel(%arg0: i32, %arg1: i32, %arg2: i32, %arg3: memref<128x128xf32, #tpu.memory_space<vmem>>, %arg4: memref<1x128xf32, #tpu.memory_space<vmem>>, %arg5: memref<1x128xf32, #tpu.memory_space<vmem>>, %arg6: memref<128x32xbf16, #tpu.memory_space<vmem>>, %arg7: memref<128x32xbf16, #tpu.memory_space<vmem>>, %arg8: memref<1x1x32xf32, #tpu.memory_space<vmem>>, %arg9: memref<1x1x32xf32, #tpu.memory_space<vmem>>, %arg10: memref<128x32xf32, #tpu.memory_space<vmem>>) attributes {dimension_semantics = [#tpu.dimension_semantics<parallel>, #tpu.dimension_semantics<parallel>, #tpu.dimension_semantics<arbitrary>], iteration_bounds = array<i64: 1, 1, 1>, scalar_prefetch = 0 : i64, scratch_operands = 1 : i64, tpu.core_type = #tpu.core_type<tc>, window_params = [{transform_indices = @transform_0, window_bounds = array<i64: 128, 128>}, {transform_indices = @transform_1, window_bounds = array<i64: 1, 128>}, {transform_indices = @transform_2, window_bounds = array<i64: 1, 128>}, {transform_indices = @transform_3, window_bounds = array<i64: 128, 32>}, {transform_indices = @transform_4, window_bounds = array<i64: 128, 32>}, {transform_indices = @transform_5, window_bounds = array<i64: 1, 1, 32>}, {transform_indices = @transform_6, window_bounds = array<i64: 1, 1, 32>}]} {
    %c0_i32 = arith.constant 0 : i32
    %0 = arith.cmpi eq, %arg2, %c0_i32 : i32
    %1 = arith.extui %0 : i1 to i32
    %c0_i32_0 = arith.constant 0 : i32
    %2 = arith.cmpi ne, %1, %c0_i32_0 : i32
    scf.if %2 {
      %cst_10 = arith.constant 0.000000e+00 : f32
      %13 = vector.broadcast %cst_10 : f32 to vector<128x32xf32>
      %c0_11 = arith.constant 0 : index
      %c0_12 = arith.constant 0 : index
      %14 = vector.load %arg10[%c0_11, %c0_12] : memref<128x32xf32, #tpu.memory_space<vmem>>, vector<128x32xf32>
      tpu.vector_store %arg10[%c0_11, %c0_12], %13 {strides = array<i32>} : memref<128x32xf32, #tpu.memory_space<vmem>>, vector<128x32xf32>,
    } else {
    }
    %c0 = arith.constant 0 : index
    %c0_1 = arith.constant 0 : index
    %3 = vector.load %arg3[%c0, %c0_1] : memref<128x128xf32, #tpu.memory_space<vmem>>, vector<128x128xf32>
    %c0_2 = arith.constant 0 : index
    %c0_3 = arith.constant 0 : index
    %4 = vector.load %arg10[%c0_2, %c0_3] : memref<128x32xf32, #tpu.memory_space<vmem>>, vector<128x32xf32>
    %5 = arith.truncf %3 : vector<128x128xf32> to vector<128x128xbf16>
    %c0_4 = arith.constant 0 : index
    %c0_5 = arith.constant 0 : index
    %6 = vector.load %arg6[%c0_4, %c0_5] : memref<128x32xbf16, #tpu.memory_space<vmem>>, vector<128x32xbf16>
    %cst = arith.constant dense<0.000000e+00> : vector<128x32xf32>
    %7 = tpu.matmul %5, %6, %cst {dimension_numbers = #tpu.dot_dimension_numbers<[1], [0], [0], [1], [0, 0, 1, 1], [], []>} : vector<128x128xbf16>, vector<128x32xbf16>, vector<128x32xf32> -> vector<128x32xf32>
    %8 = arith.addf %4, %7 : vector<128x32xf32>
    %c0_6 = arith.constant 0 : index
    %c0_7 = arith.constant 0 : index
    %9 = vector.load %arg10[%c0_6, %c0_7] : memref<128x32xf32, #tpu.memory_space<vmem>>, vector<128x32xf32>
    tpu.vector_store %arg10[%c0_6, %c0_7], %8 {strides = array<i32>} : memref<128x32xf32, #tpu.memory_space<vmem>>, vector<128x32xf32>,
    %c0_i32_8 = arith.constant 0 : i32
    %10 = arith.cmpi eq, %arg2, %c0_i32_8 : i32
    %11 = arith.extui %10 : i1 to i32
    %c0_i32_9 = arith.constant 0 : i32
    %12 = arith.cmpi ne, %11, %c0_i32_9 : i32
    scf.if %12 {
      %c0_10 = arith.constant 0 : index
      %c0_11 = arith.constant 0 : index
      %13 = vector.load %arg10[%c0_10, %c0_11] : memref<128x32xf32, #tpu.memory_space<vmem>>, vector<128x32xf32>
      %14 = arith.truncf %13 : vector<128x32xf32> to vector<128x32xbf16>
      %c0_12 = arith.constant 0 : index
      %c0_13 = arith.constant 0 : index
      %15 = vector.load %arg7[%c0_12, %c0_13] : memref<128x32xbf16, #tpu.memory_space<vmem>>, vector<128x32xbf16>
      tpu.vector_store %arg7[%c0_12, %c0_13], %14 {strides = array<i32>} : memref<128x32xbf16, #tpu.memory_space<vmem>>, vector<128x32xbf16>,
      %cst_14 = arith.constant dense<0.000000e+00> : vector<32xf32>
      %16 = vector.multi_reduction <add>, %13, %cst_14 [0] : vector<128x32xf32> to vector<32xf32>
      %17 = vector.shape_cast %16 : vector<32xf32> to vector<1x32xf32>
      %18 = vector.shape_cast %17 : vector<1x32xf32> to vector<1x1x32xf32>
      %c0_15 = arith.constant 0 : index
      %c0_16 = arith.constant 0 : index
      %c0_17 = arith.constant 0 : index
      %19 = vector.load %arg8[%c0_15, %c0_16, %c0_17] : memref<1x1x32xf32, #tpu.memory_space<vmem>>, vector<1x1x32xf32>
      tpu.vector_store %arg8[%c0_15, %c0_16, %c0_17], %18 {strides = array<i32>} : memref<1x1x32xf32, #tpu.memory_space<vmem>>, vector<1x1x32xf32>,
      %20 = arith.mulf %13, %13 : vector<128x32xf32>
      %cst_18 = arith.constant dense<0.000000e+00> : vector<32xf32>
      %21 = vector.multi_reduction <add>, %20, %cst_18 [0] : vector<128x32xf32> to vector<32xf32>
      %22 = vector.shape_cast %21 : vector<32xf32> to vector<1x32xf32>
      %23 = vector.shape_cast %22 : vector<1x32xf32> to vector<1x1x32xf32>
      %c0_19 = arith.constant 0 : index
      %c0_20 = arith.constant 0 : index
      %c0_21 = arith.constant 0 : index
      %24 = vector.load %arg9[%c0_19, %c0_20, %c0_21] : memref<1x1x32xf32, #tpu.memory_space<vmem>>, vector<1x1x32xf32>
      tpu.vector_store %arg9[%c0_19, %c0_20, %c0_21], %23 {strides = array<i32>} : memref<1x1x32xf32, #tpu.memory_space<vmem>>, vector<1x1x32xf32>,
    } else {
    }
    return
  }
  func.func @transform_0(%arg0: i32, %arg1: i32, %arg2: i32) -> (i32, i32) {
    %c0_i32 = arith.constant 0 : i32
    return %arg0, %arg2 : i32, i32
  }
  func.func @transform_1(%arg0: i32, %arg1: i32, %arg2: i32) -> (i32, i32) {
    %c0_i32 = arith.constant 0 : i32
    %c0_i32_0 = arith.constant 0 : i32
    return %c0_i32, %arg2 : i32, i32
  }
  func.func @transform_2(%arg0: i32, %arg1: i32, %arg2: i32) -> (i32, i32) {
    %c0_i32 = arith.constant 0 : i32
    %c0_i32_0 = arith.constant 0 : i32
    return %c0_i32, %arg2 : i32, i32
  }
  func.func @transform_3(%arg0: i32, %arg1: i32, %arg2: i32) -> (i32, i32) {
    %c0_i32 = arith.constant 0 : i32
    return %arg2, %arg1 : i32, i32
  }
  func.func @transform_4(%arg0: i32, %arg1: i32, %arg2: i32) -> (i32, i32) {
    %c0_i32 = arith.constant 0 : i32
    return %arg0, %arg1 : i32, i32
  }
  func.func @transform_5(%arg0: i32, %arg1: i32, %arg2: i32) -> (i32, i32, i32) {
    %c0_i32 = arith.constant 0 : i32
    %c0_i32_0 = arith.constant 0 : i32
    return %arg0, %c0_i32, %arg1 : i32, i32, i32
  }
  func.func @transform_6(%arg0: i32, %arg1: i32, %arg2: i32) -> (i32, i32, i32) {
    %c0_i32 = arith.constant 0 : i32
    %c0_i32_0 = arith.constant 0 : i32
    return %arg0, %c0_i32, %arg1 : i32, i32, i32
  }
}

</mosaic_0001>

<bundles_post_ra>
// kernel: tpu_custom_call.1
= control target key start
LH: loop header
LB: loop body
LE: loop exit
PB: predicated region body
PF: predicated region fallthrough
CT: control target
= control target key end

     0   :  { %12 = vsyncpa [#allocation4], 0  ;;  %s1002_s0 = inlined_call_operand.hbm [shape: f32[128,128], index: 0, kind: input, shape index: {}]   ;;  %s1003_s1 = inlined_call_operand.vmem [shape: f32[1,128], index: 1, kind: input, shape index: {}]   ;;  %s1004_s2 = inlined_call_operand.vmem [shape: f32[1,128], index: 2, kind: input, shape index: {}]   ;;  %s1005_s3 = inlined_call_operand.vmem [shape: bf16[128,32], index: 3, kind: input, shape index: {}]   ;;  %s1006_s4 = inlined_call_operand.vmem [shape: bf16[128,32], index: 4, kind: output, shape index: {0}]   ;;  %s1007_s5 = inlined_call_operand.hbm [shape: f32[1,1,32], index: 5, kind: output, shape index: {1}]   ;;  %s1008_s6 = inlined_call_operand.hbm [shape: f32[1,1,32], index: 6, kind: output, shape index: {2}]  }
   0x1   :  { %13 = vsyncpa [#allocation5], 0 }
   0x2   :  { %14 = vsyncpa [#allocation8], 0  ;;  %s708_s21 = smov [#allocation3]   ;;  %s636_s23 = scalar_lea.hbm %s1002_s0, 2048 }
   0x3   :  { %s20_s1 = sshll.u32 %s708_s21, 4  ;;  %p637_p0 = scmp.ne.s32.totalorder %s1002_s0, %s636_s23  ;;  %s21_s1 = int_to_ptr.vmem [resolvable:$true] %s20_s1 }
   0x4   :  { %p640_p1 = scmp.lt.u32.totalorder %s636_s23, %s1002_s0 }
   0x6   :  { %p642_p2 = pnand %p640_p1, %p637_p0 }
   0x8   :  { %645 = shalt.err (!%p642_p2)
}
   0x9   :  { %s646_s28 = scalar_lea.vmem %s21_s1, 2048  ;;  %p651_p4 = scmp.lt.s32.totalorder %s21_s1, %s21_s1 }
   0xa   :  { %p647_p3 = scmp.ne.s32.totalorder %s21_s1, %s646_s28  ;;  %p652_p5 = scmp.lt.s32.totalorder %s646_s28, %s646_s28 }
   0xc   :  { %p653_p6 = por %p652_p5, %p651_p4 }
   0xe   :  { %p654_p7 = pnand %p653_p6, %p647_p3 }
  0x10   :  { %657 = shalt.err (!%p654_p7)
}
  0x11   :  { %s709_s29 = smov 128   ;;  %s710_s30 = smov 8  }
  0x12   :  { %26 = dma.hbm_to_vmem [thread:$0]  %s1002_s0, 2048, %s21_s1, [#allocation4], %s709_s29, %s709_s29, %s710_s30  }
  0x13   :  { %702 = dma.done.wait [#allocation4], 2048  }
  0x14   :  { %703 = vsyncadd [#allocation4], 4294965248  ;;  %vm41_vm0 = vcmask 261120   ;;  %v711_v0 = vmov 0.0   ;;  %v628_v1 = vld [vmem:[%s1005_s3] sm:$0xff]   ;;  %v629_v2 = vld [vmem:[%s1005_s3 + $0x8] sm:$0xff]  }
  0x15   :  { %44 = vst.msk [vmem:[#allocation2 + $0x10] sm:$0xff] %vm41_vm0, %v711_v0  ;;  %42 = vst.msk [vmem:[#allocation2] sm:$0xff] %vm41_vm0, %v711_v0  ;;  %574 = vmatprep.subr.bf16.mxu0 %v628_v1  ;;  %606 = vmatprep.subr.bf16.mxu1 %v628_v1  ;;  %v630_v3 = vld [vmem:[%s1005_s3 + $0x10] sm:$0xff]   ;;  %v631_v4 = vld [vmem:[%s1005_s3 + $0x18] sm:$0xff]   ;;  %vm375_vm1 = vcmask 257024   ;;  %vm429_vm2 = vcmask 253952  }
  0x16   :  { %43 = vst.msk [vmem:[#allocation2 + $0x8] sm:$0xff] %vm41_vm0, %v711_v0  ;;  %45 = vst.msk [vmem:[#allocation2 + $0x18] sm:$0xff] %vm41_vm0, %v711_v0  ;;  %575 = vmatpush3.bf16.msra.mxu0 %v628_v1  ;;  %614 = vmatpush3.bf16.msra.mxu1 %v628_v1  ;;  %v58_v5 = vld [vmem:[#allocation3] sm:$0xff]  ;;  %v59_v6 = vld [vmem:[#allocation3 + $0x8] sm:$0xff] }
  0x17   :  { %46 = vst.msk [vmem:[#allocation2 + $0x20] sm:$0xff] %vm41_vm0, %v711_v0  ;;  %47 = vst.msk [vmem:[#allocation2 + $0x28] sm:$0xff] %vm41_vm0, %v711_v0  ;;  %576 = vmatprep.subr.bf16.mxu0 %v629_v2  ;;  %607 = vmatprep.subr.bf16.mxu1 %v629_v2  ;;  %v90_v7 = vpack.c.bf16 %v59_v6, %v58_v5  ;;  %v66_v8 = vld [vmem:[#allocation3 + $0x40] sm:$0xff]  ;;  %v67_v9 = vld [vmem:[#allocation3 + $0x48] sm:$0xff] }
  0x18   :  { %48 = vst.msk [vmem:[#allocation2 + $0x30] sm:$0xff] %vm41_vm0, %v711_v0  ;;  %49 = vst.msk [vmem:[#allocation2 + $0x38] sm:$0xff] %vm41_vm0, %v711_v0  ;;  %v632_v10 = vld [vmem:[%s1005_s3 + $0x20] sm:$0xff]   ;;  %v94_v11 = vpack.c.bf16 %v67_v9, %v66_v8  ;;  %v633_v12 = vld [vmem:[%s1005_s3 + $0x28] sm:$0xff]  }
  0x19   :  { %50 = vst.msk [vmem:[#allocation2 + $0x40] sm:$0xff] %vm41_vm0, %v711_v0  ;;  %51 = vst.msk [vmem:[#allocation2 + $0x48] sm:$0xff] %vm41_vm0, %v711_v0  ;;  %590 = vmatprep.mubr.bf16.mxu0 %v90_v7  ;;  %v634_v13 = vld [vmem:[%s1005_s3 + $0x30] sm:$0xff]   ;;  %v635_v14 = vld [vmem:[%s1005_s3 + $0x38] sm:$0xff]  }
  0x1a   :  { %52 = vst.msk [vmem:[#allocation2 + $0x50] sm:$0xff] %vm41_vm0, %v711_v0  ;;  %53 = vst.msk [vmem:[#allocation2 + $0x58] sm:$0xff] %vm41_vm0, %v711_v0  ;;  %577 = vmatpush3.bf16.msra.mxu0 %v629_v2  ;;  %615 = vmatpush3.bf16.msra.mxu1 %v629_v2  ;;  %v60_v15 = vld [vmem:[#allocation3 + $0x10] sm:$0xff]  ;;  %v61_v16 = vld [vmem:[#allocation3 + $0x18] sm:$0xff] }
  0x1b   :  { %54 = vst.msk [vmem:[#allocation2 + $0x60] sm:$0xff] %vm41_vm0, %v711_v0  ;;  %55 = vst.msk [vmem:[#allocation2 + $0x68] sm:$0xff] %vm41_vm0, %v711_v0  ;;  %578 = vmatprep.subr.bf16.mxu0 %v630_v3  ;;  %608 = vmatprep.subr.bf16.mxu1 %v630_v3  ;;  %v62_v17 = vld [vmem:[#allocation3 + $0x20] sm:$0xff]  ;;  %v68_v18 = vld [vmem:[#allocation3 + $0x50] sm:$0xff]  ;;  %v91_v23 = vpack.c.bf16 %v61_v16, %v60_v15 }
  0x1c   :  { %56 = vst.msk [vmem:[#allocation2 + $0x70] sm:$0xff] %vm41_vm0, %v711_v0  ;;  %57 = vst.msk [vmem:[#allocation2 + $0x78] sm:$0xff] %vm41_vm0, %v711_v0  ;;  %598 = vmatprep.mubr.bf16.mxu1 %v94_v11  ;;  %v69_v19 = vld [vmem:[#allocation3 + $0x58] sm:$0xff]  ;;  %v63_v20 = vld [vmem:[#allocation3 + $0x28] sm:$0xff] }
  0x1d   :  { %v70_v21 = vld [vmem:[#allocation3 + $0x60] sm:$0xff]  ;;  %v71_v22 = vld [vmem:[#allocation3 + $0x68] sm:$0xff]  ;;  %v95_v24 = vpack.c.bf16 %v69_v19, %v68_v18  ;;  %v92_v25 = vpack.c.bf16 %v63_v20, %v62_v17  ;;  %v64_v27 = vld [vmem:[#allocation3 + $0x30] sm:$0xff] }
  0x1e   :  { %579 = vmatpush3.bf16.msra.mxu0 %v630_v3  ;;  %616 = vmatpush3.bf16.msra.mxu1 %v630_v3  ;;  %v96_v26 = vpack.c.bf16 %v71_v22, %v70_v21  ;;  %v65_v28 = vld [vmem:[#allocation3 + $0x38] sm:$0xff]  ;;  %v72_v29 = vld [vmem:[#allocation3 + $0x70] sm:$0xff]  ;;  %v74_v35 = vld [vmem:[#allocation2] sm:$0xff] }
  0x1f   :  { %580 = vmatprep.subr.bf16.mxu0 %v631_v4  ;;  %609 = vmatprep.subr.bf16.mxu1 %v631_v4  ;;  %v73_v30 = vld [vmem:[#allocation3 + $0x78] sm:$0xff]  ;;  %v93_v31 = vpack.c.bf16 %v65_v28, %v64_v27  ;;  %v76_v33 = vld [vmem:[#allocation2 + $0x10] sm:$0xff]  ;;  %v75_v43 = vld [vmem:[#allocation2 + $0x8] sm:$0xff] }
  0x20   :  { %v97_v32 = vpack.c.bf16 %v73_v30, %v72_v29  ;;  %v82_v36 = vld [vmem:[#allocation2 + $0x40] sm:$0xff]  ;;  %v77_v38 = vld [vmem:[#allocation2 + $0x18] sm:$0xff]  ;;  %v83_v46 = vld [vmem:[#allocation2 + $0x48] sm:$0xff] }
  0x21   :  { %v84_v34 = vld [vmem:[#allocation2 + $0x50] sm:$0xff]  ;;  %v85_v40 = vld [vmem:[#allocation2 + $0x58] sm:$0xff]  ;;  %v78_v59 = vld [vmem:[#allocation2 + $0x20] sm:$0xff] }
  0x22   :  { %581 = vmatpush3.bf16.msra.mxu0 %v631_v4  ;;  %617 = vmatpush3.bf16.msra.mxu1 %v631_v4  ;;  %v80_v57 = vld [vmem:[#allocation2 + $0x30] sm:$0xff]  ;;  %v86_v60 = vld [vmem:[#allocation2 + $0x60] sm:$0xff]  ;;  %v81_v62 = vld [vmem:[#allocation2 + $0x38] sm:$0xff] }
  0x23   :  { %582 = vmatprep.subr.bf16.mxu0 %v632_v10  ;;  %610 = vmatprep.subr.bf16.mxu1 %v632_v10  ;;  %v88_v58 = vld [vmem:[#allocation2 + $0x70] sm:$0xff]  ;;  %v89_v0 = vld [vmem:[#allocation2 + $0x78] sm:$0xff]  ;;  %v79_v3 = vld [vmem:[#allocation2 + $0x28] sm:$0xff] }
  0x24   :  { %v87_v6 = vld [vmem:[#allocation2 + $0x68] sm:$0xff] }
  0x26   :  { %583 = vmatpush3.bf16.msra.mxu0 %v632_v10  ;;  %618 = vmatpush3.bf16.msra.mxu1 %v632_v10 }
  0x27   :  { %584 = vmatprep.subr.bf16.mxu0 %v633_v12  ;;  %611 = vmatprep.subr.bf16.mxu1 %v633_v12 }
  0x2a   :  { %585 = vmatpush3.bf16.msra.mxu0 %v633_v12  ;;  %619 = vmatpush3.bf16.msra.mxu1 %v633_v12 }
  0x2b   :  { %586 = vmatprep.subr.bf16.mxu0 %v634_v13  ;;  %612 = vmatprep.subr.bf16.mxu1 %v634_v13 }
  0x2e   :  { %587 = vmatpush3.bf16.msra.mxu0 %v634_v13  ;;  %620 = vmatpush3.bf16.msra.mxu1 %v634_v13 }
  0x2f   :  { %588 = vmatprep.subr.bf16.mxu0 %v635_v14  ;;  %613 = vmatprep.subr.bf16.mxu1 %v635_v14 }
  0x32   :  { %589 = vmatpush3.bf16.msra.mxu0 %v635_v14  ;;  %621 = vmatpush3.bf16.msra.mxu1 %v635_v14 }
  0x35   :  { %591 = vmatmul.mubr.bf16.vlgmr.msra.gmra.mrb[0].mxu0 %v91_v23  ;;  %599 = vmatmul.mubr.bf16.vlgmr.msra.gmra.mrb[0].mxu1 %v95_v24 }
  0x36   :  { %594 = vmatprep.mubr.bf16.mxu0 %v92_v25  ;;  %602 = vmatprep.mubr.bf16.mxu1 %v96_v26 }
  0x3d   :  { %595 = vmatmul.mubr.bf16.gmra.mrb[4].mxu0 %v93_v31  ;;  %603 = vmatmul.mubr.bf16.gmra.mrb[4].mxu1 %v97_v32 }
 0x108   :  { %v592_v37 = vpop.f32.mrb[0].mxu0  ;;  %v600_v39 = vpop.f32.mrb[0].mxu1 }
 0x109   :  { %v261_v41 = vadd.f32 %v592_v37, %v76_v33  ;;  %v196_v42 = vpop.f32.mrb[1].mxu0  ;;  %v269_v44 = vadd.f32 %v600_v39, %v84_v34  ;;  %v228_v45 = vpop.f32.mrb[1].mxu1 }
 0x10a   :  { %v259_v47 = vadd.f32 %v196_v42, %v74_v35  ;;  %v593_v48 = vpop.f32.mrb[2].mxu0  ;;  %v267_v49 = vadd.f32 %v228_v45, %v82_v36  ;;  %v601_v50 = vpop.f32.mrb[2].mxu1 }
 0x10b   :  { %278 = vst.msk [vmem:[#allocation2 + $0x10] sm:$0xff] %vm41_vm0, %v261_v41  ;;  %v262_v51 = vadd.f32 %v593_v48, %v77_v38  ;;  %v199_v52 = vpop.f32.mrb[3].mxu0  ;;  %286 = vst.msk [vmem:[#allocation2 + $0x50] sm:$0xff] %vm41_vm0, %v269_v44  ;;  %v270_v53 = vadd.f32 %v601_v50, %v85_v40  ;;  %v231_v54 = vpop.f32.mrb[3].mxu1 }
 0x10c   :  { %276 = vst.msk [vmem:[#allocation2] sm:$0xff] %vm41_vm0, %v259_v47  ;;  %v260_v55 = vadd.f32 %v199_v52, %v75_v43  ;;  %284 = vst.msk [vmem:[#allocation2 + $0x40] sm:$0xff] %vm41_vm0, %v267_v49  ;;  %v268_v56 = vadd.f32 %v231_v54, %v83_v46 }
 0x10d   :  { %279 = vst.msk [vmem:[#allocation2 + $0x18] sm:$0xff] %vm41_vm0, %v262_v51  ;;  %287 = vst.msk [vmem:[#allocation2 + $0x58] sm:$0xff] %vm41_vm0, %v270_v53 }
 0x10e   :  { %277 = vst.msk [vmem:[#allocation2 + $0x8] sm:$0xff] %vm41_vm0, %v260_v55  ;;  %285 = vst.msk [vmem:[#allocation2 + $0x48] sm:$0xff] %vm41_vm0, %v268_v56 }
 0x110   :  { %v596_v61 = vpop.f32.mrb[4].mxu0  ;;  %v604_v63 = vpop.f32.mrb[4].mxu1 }
 0x111   :  { %v265_v1 = vadd.f32 %v596_v61, %v80_v57  ;;  %v212_v2 = vpop.f32.mrb[5].mxu0  ;;  %v273_v4 = vadd.f32 %v604_v63, %v88_v58  ;;  %v244_v5 = vpop.f32.mrb[5].mxu1 }
 0x112   :  { %v809_v7 = vld [vmem:[#allocation2 + $0x10] sm:$0xff]  ;;  %v263_v8 = vadd.f32 %v212_v2, %v78_v59  ;;  %v597_v9 = vpop.f32.mrb[6].mxu0  ;;  %v271_v10 = vadd.f32 %v244_v5, %v86_v60  ;;  %v605_v11 = vpop.f32.mrb[6].mxu1 }
 0x113   :  { %v811_v12 = vld [vmem:[#allocation2 + $0x50] sm:$0xff]  ;;  %v544_v13 = vpack.c.bf16 %v809_v7, %v809_v7  ;;  %v295_v14 = vld [vmem:[#allocation2] sm:$0xff]  ;;  %282 = vst.msk [vmem:[#allocation2 + $0x30] sm:$0xff] %vm41_vm0, %v265_v1  ;;  %v266_v15 = vadd.f32 %v597_v9, %v81_v62  ;;  %v215_v16 = vpop.f32.mrb[7].mxu0  ;;  %290 = vst.msk [vmem:[#allocation2 + $0x70] sm:$0xff] %vm41_vm0, %v273_v4  ;;  %v274_v17 = vadd.f32 %v605_v11, %v89_v0  ;;  %v247_v18 = vpop.f32.mrb[7].mxu1 }
 0x114   :  { %v817_v19 = vld [vmem:[#allocation2 + $0x40] sm:$0xff]  ;;  %v552_v20 = vpack.c.bf16 %v811_v12, %v811_v12  ;;  %v542_v21 = vpack.c.bf16 %v295_v14, %v295_v14  ;;  %280 = vst.msk [vmem:[#allocation2 + $0x20] sm:$0xff] %vm41_vm0, %v263_v8  ;;  %v264_v22 = vadd.f32 %v215_v16, %v79_v3  ;;  %288 = vst.msk [vmem:[#allocation2 + $0x60] sm:$0xff] %vm41_vm0, %v271_v10  ;;  %v298_v24 = vld [vmem:[#allocation2 + $0x18] sm:$0xff]  ;;  %v392_v33 = vsel %vm41_vm0, %v295_v14, 0.0 }
 0x115   :  { %v272_v23 = vadd.f32 %v247_v18, %v87_v6  ;;  %v823_v25 = vld [vmem:[#allocation2 + $0x58] sm:$0xff]  ;;  %378 = vst.msk [vmem:[%s1006_s4 + $0x8] sm:$0xf] %vm375_vm1, %v544_v13  ;;  %v296_v26 = vld [vmem:[#allocation2 + $0x8] sm:$0xff]  ;;  %v545_v28 = vpack.c.bf16 %v298_v24, %v298_v24  ;;  %v550_v29 = vpack.c.bf16 %v817_v19, %v817_v19  ;;  %v395_v36 = vsel %vm41_vm0, %v809_v7, 0.0 }
 0x116   :  { %283 = vst.msk [vmem:[#allocation2 + $0x38] sm:$0xff] %vm41_vm0, %v266_v15  ;;  %291 = vst.msk [vmem:[#allocation2 + $0x78] sm:$0xff] %vm41_vm0, %v274_v17  ;;  %v831_v27 = vld [vmem:[#allocation2 + $0x48] sm:$0xff]  ;;  %v553_v30 = vpack.c.bf16 %v823_v25, %v823_v25  ;;  %v543_v31 = vpack.c.bf16 %v296_v26, %v296_v26  ;;  %v393_v34 = vsel %vm41_vm0, %v296_v26, 0.0  ;;  %v397_v40 = vsel %vm41_vm0, %v298_v24, 0.0 }
 0x117   :  { %386 = vst.msk [vmem:[%s1006_s4 + $0x28] sm:$0xf] %vm375_vm1, %v552_v20  ;;  %376 = vst.msk [vmem:[%s1006_s4] sm:$0xf] %vm375_vm1, %v542_v21  ;;  %v551_v32 = vpack.c.bf16 %v831_v27, %v831_v27  ;;  %v394_v35 = vadd.f32 %v393_v34, %v392_v33  ;;  %v432_v41 = vmul.f32 %v296_v26, %v296_v26  ;;  %v407_v6 = vsel %vm41_vm0, %v817_v19, 0.0 }
 0x118   :  { %281 = vst.msk [vmem:[#allocation2 + $0x28] sm:$0xff] %vm41_vm0, %v264_v22  ;;  %289 = vst.msk [vmem:[#allocation2 + $0x68] sm:$0xff] %vm41_vm0, %v272_v23  ;;  %v431_v52 = vmul.f32 %v295_v14, %v295_v14  ;;  %v433_v62 = vmul.f32 %v809_v7, %v809_v7  ;;  %v434_v2 = vmul.f32 %v298_v24, %v298_v24  ;;  %v409_v16 = vsel %vm41_vm0, %v831_v27, 0.0 }
 0x119   :  { %379 = vst.msk [vmem:[%s1006_s4 + $0xc] sm:$0xf] %vm375_vm1, %v545_v28  ;;  %384 = vst.msk [vmem:[%s1006_s4 + $0x20] sm:$0xf] %vm375_vm1, %v550_v29  ;;  %v396_v37 = vadd.f32 %v395_v36, %v394_v35  ;;  %v448_v63 = vsel %vm41_vm0, %v432_v41, 0.0  ;;  %v411_v22 = vsel %vm41_vm0, %v811_v12, 0.0  ;;  %v439_v28 = vmul.f32 %v817_v19, %v817_v19 }
 0x11a   :  { %387 = vst.msk [vmem:[%s1006_s4 + $0x2c] sm:$0xf] %vm375_vm1, %v553_v30  ;;  %377 = vst.msk [vmem:[%s1006_s4 + $0x4] sm:$0xf] %vm375_vm1, %v543_v31  ;;  %v301_v38 = vld [vmem:[#allocation2 + $0x30] sm:$0xff]  ;;  %v447_v4 = vsel %vm41_vm0, %v431_v52, 0.0  ;;  %v440_v36 = vmul.f32 %v831_v27, %v831_v27  ;;  %v442_v27 = vmul.f32 %v823_v25, %v823_v25 }
 0x11b   :  { %385 = vst.msk [vmem:[%s1006_s4 + $0x24] sm:$0xf] %vm375_vm1, %v551_v32  ;;  %v873_v39 = vld [vmem:[#allocation2 + $0x70] sm:$0xff]  ;;  %v299_v42 = vld [vmem:[#allocation2 + $0x20] sm:$0xff]  ;;  %v548_v44 = vpack.c.bf16 %v301_v38, %v301_v38  ;;  %v398_v46 = vadd.f32 %v397_v40, %v396_v37  ;;  %v403_v0 = vsel %vm41_vm0, %v301_v38, 0.0  ;;  %v449_v7 = vadd.f32 %v448_v63, %v447_v4 }
 0x11c   :  { %v876_v43 = vld [vmem:[#allocation2 + $0x60] sm:$0xff]  ;;  %v556_v45 = vpack.c.bf16 %v873_v39, %v873_v39  ;;  %v546_v49 = vpack.c.bf16 %v299_v42, %v299_v42  ;;  %v399_v51 = vsel %vm41_vm0, %v299_v42, 0.0  ;;  %v435_v3 = vmul.f32 %v299_v42, %v299_v42 }
 0x11d   :  { %v302_v47 = vld [vmem:[#allocation2 + $0x38] sm:$0xff]  ;;  %v554_v50 = vpack.c.bf16 %v876_v43, %v876_v43  ;;  %382 = vst.msk [vmem:[%s1006_s4 + $0x18] sm:$0xf] %vm375_vm1, %v548_v44  ;;  %v400_v57 = vadd.f32 %v399_v51, %v398_v46  ;;  %v450_v10 = vsel %vm41_vm0, %v433_v62, 0.0  ;;  %v452_v14 = vsel %vm41_vm0, %v434_v2, 0.0 }
 0x11e   :  { %v880_v48 = vld [vmem:[#allocation2 + $0x78] sm:$0xff]  ;;  %v549_v55 = vpack.c.bf16 %v302_v47, %v302_v47  ;;  %390 = vst.msk [vmem:[%s1006_s4 + $0x38] sm:$0xf] %vm375_vm1, %v556_v45  ;;  %380 = vst.msk [vmem:[%s1006_s4 + $0x10] sm:$0xf] %vm375_vm1, %v546_v49  ;;  %v405_v5 = vsel %vm41_vm0, %v302_v47, 0.0  ;;  %v451_v11 = vadd.f32 %v450_v10, %v449_v7  ;;  %v437_v20 = vmul.f32 %v301_v38, %v301_v38 }
 0x11f   :  { %v300_v53 = vld [vmem:[#allocation2 + $0x28] sm:$0xff]  ;;  %v557_v56 = vpack.c.bf16 %v880_v48, %v880_v48  ;;  %388 = vst.msk [vmem:[%s1006_s4 + $0x30] sm:$0xf] %vm375_vm1, %v554_v50  ;;  %v454_v15 = vsel %vm41_vm0, %v435_v3, 0.0  ;;  %v438_v26 = vmul.f32 %v302_v47, %v302_v47  ;;  %v413_v29 = vsel %vm41_vm0, %v823_v25, 0.0 }
 0x120   :  { %v885_v54 = vld [vmem:[#allocation2 + $0x68] sm:$0xff]  ;;  %v547_v58 = vpack.c.bf16 %v300_v53, %v300_v53  ;;  %v401_v60 = vsel %vm41_vm0, %v300_v53, 0.0  ;;  %383 = vst.msk [vmem:[%s1006_s4 + $0x1c] sm:$0xf] %vm375_vm1, %v549_v55  ;;  %v436_v9 = vmul.f32 %v300_v53, %v300_v53  ;;  %v453_v17 = vadd.f32 %v452_v14, %v451_v11 }
 0x121   :  { %v555_v59 = vpack.c.bf16 %v885_v54, %v885_v54  ;;  %391 = vst.msk [vmem:[%s1006_s4 + $0x3c] sm:$0xf] %vm375_vm1, %v557_v56  ;;  %v402_v61 = vadd.f32 %v401_v60, %v400_v57  ;;  %v415_v30 = vsel %vm41_vm0, %v876_v43, 0.0  ;;  %v458_v33 = vsel %vm41_vm0, %v437_v20, 0.0 }
 0x122   :  { %381 = vst.msk [vmem:[%s1006_s4 + $0x14] sm:$0xf] %vm375_vm1, %v547_v58  ;;  %v456_v21 = vsel %vm41_vm0, %v436_v9, 0.0  ;;  %v455_v23 = vadd.f32 %v454_v15, %v453_v17  ;;  %v460_v37 = vsel %vm41_vm0, %v438_v26, 0.0  ;;  %v462_v38 = vsel %vm41_vm0, %v439_v28, 0.0 }
 0x123   :  { %389 = vst.msk [vmem:[%s1006_s4 + $0x34] sm:$0xf] %vm375_vm1, %v555_v59  ;;  %v404_v1 = vadd.f32 %v403_v0, %v402_v61  ;;  %v417_v19 = vsel %vm41_vm0, %v885_v54, 0.0  ;;  %v441_v42 = vmul.f32 %v811_v12, %v811_v12  ;;  %v419_v44 = vsel %vm41_vm0, %v873_v39, 0.0  ;;  %s712_s4 = smov [#allocation6]  }
 0x124   :  { %v457_v31 = vadd.f32 %v456_v21, %v455_v23  ;;  %v443_v47 = vmul.f32 %v876_v43, %v876_v43  ;;  %v464_v49 = vsel %vm41_vm0, %v440_v36, 0.0  ;;  %v421_v50 = vsel %vm41_vm0, %v880_v48, 0.0  ;;  %s493_s25 = sshll.u32 %s712_s4, 4  ;;  %s494_s25 = int_to_ptr.vmem [resolvable:$true] %s493_s25 }
 0x125   :  { %v406_v8 = vadd.f32 %v405_v5, %v404_v1  ;;  %v466_v12 = vsel %vm41_vm0, %v441_v42, 0.0  ;;  %v444_v56 = vmul.f32 %v885_v54, %v885_v54  ;;  %v468_v57 = vsel %vm41_vm0, %v442_v27, 0.0  ;;  %s658_s26 = scalar_lea.vmem %s494_s25, 16  ;;  %s662_s27 = scalar_lea.vmem %s494_s25, 32 }
 0x126   :  { %v459_v34 = vadd.f32 %v458_v33, %v457_v31  ;;  %v470_v25 = vsel %vm41_vm0, %v443_v47, 0.0  ;;  %v445_v59 = vmul.f32 %v873_v39, %v873_v39  ;;  %v446_v62 = vmul.f32 %v880_v48, %v880_v48  ;;  %p659_p8 = scmp.ne.s32.totalorder %s494_s25, %s658_s26  ;;  %p663_p9 = scmp.lt.s32.totalorder %s494_s25, %s494_s25 }
 0x127   :  { %v408_v13 = vadd.f32 %v407_v6, %v406_v8  ;;  %v472_v63 = vsel %vm41_vm0, %v444_v56, 0.0  ;;  %p664_p10 = scmp.lt.s32.totalorder %s662_s27, %s658_s26 }
 0x128   :  { %v461_v40 = vadd.f32 %v460_v37, %v459_v34  ;;  %v474_v54 = vsel %vm41_vm0, %v445_v59, 0.0  ;;  %v476_v4 = vsel %vm41_vm0, %v446_v62, 0.0 }
 0x129   :  { %v410_v18 = vadd.f32 %v409_v16, %v408_v13  ;;  %p665_p11 = por %p664_p10, %p663_p9 }
 0x12a   :  { %v463_v45 = vadd.f32 %v462_v38, %v461_v40 }
 0x12b   :  { %v412_v24 = vadd.f32 %v411_v22, %v410_v18  ;;  %p666_p12 = pnand %p665_p11, %p659_p8 }
 0x12c   :  { %v465_v51 = vadd.f32 %v464_v49, %v463_v45 }
 0x12d   :  { %v414_v32 = vadd.f32 %v413_v29, %v412_v24 }
 0x12e   :  { %v467_v53 = vadd.f32 %v466_v12, %v465_v51 }
 0x12f   :  { %v416_v35 = vadd.f32 %v415_v30, %v414_v32 }
 0x130   :  { %v469_v58 = vadd.f32 %v468_v57, %v467_v53 }
 0x131   :  { %v418_v41 = vadd.f32 %v417_v19, %v416_v35 }
 0x132   :  { %v471_v60 = vadd.f32 %v470_v25, %v469_v58 }
 0x133   :  { %v420_v46 = vadd.f32 %v419_v44, %v418_v41 }
 0x134   :  { %v473_v0 = vadd.f32 %v472_v63, %v471_v60 }
 0x135   :  { %v422_v52 = vadd.f32 %v421_v50, %v420_v46 }
 0x136   :  { %v475_v2 = vadd.f32 %v474_v54, %v473_v0 }
 0x137   :  { %v423_v55 = vrot.slane %v422_v52, 4 }
 0x138   :  { %v477_v5 = vadd.f32 %v476_v4, %v475_v2 }
 0x139   :  { %v424_v43 = vadd.f32 %v423_v55, %v422_v52 }
 0x13a   :  { %v478_v6 = vrot.slane %v477_v5, 4 }
 0x13b   :  { %v425_v61 = vrot.slane %v424_v43, 2 }
 0x13d   :  { %v426_v1 = vadd.f32 %v425_v61, %v424_v43 }
 0x13f   :  { %v427_v3 = vrot.slane %v426_v1, 1 }
 0x141   :  { %v428_v39 = vadd.f32 %v427_v3, %v426_v1 }
 0x143   :  { %430 = vst.msk [vmem:[#allocation6] sm:$0x1] %vm429_vm2, %v428_v39 }
 0x144   :  { %669 = shalt.err (!%p666_p12)
}
 0x145   :  { %s670_s30 = scalar_lea.hbm %s1007_s5, 16 }
 0x146   :  { %p671_p13 = scmp.ne.s32.totalorder %s1007_s5, %s670_s30  ;;  %p674_p0 = scmp.lt.u32.totalorder %s670_s30, %s1007_s5 }
 0x148   :  { %p676_p1 = pnand %p674_p0, %p671_p13 }
 0x14a   :  { %679 = shalt.err (!%p676_p1)
}
 0x14b   :  { %496 = dma.vmem_to_hbm [thread:$0]  %s494_s25, 16, %s1007_s5, [#allocation5]   ;;  %v479_v48 = vadd.f32 %v478_v6, %v477_v5 }
 0x14c   :  { %s713_s12 = smov [#allocation7]  }
 0x14d   :  { %v480_v7 = vrot.slane %v479_v48, 2  ;;  %s503_s13 = sshll.u32 %s713_s12, 4  ;;  %s504_s13 = int_to_ptr.vmem [resolvable:$true] %s503_s13 }
 0x14e   :  { %s680_s14 = scalar_lea.vmem %s504_s13, 16  ;;  %s684_s15 = scalar_lea.vmem %s504_s13, 32 }
 0x14f   :  { %v481_v8 = vadd.f32 %v480_v7, %v479_v48  ;;  %p681_p2 = scmp.ne.s32.totalorder %s504_s13, %s680_s14  ;;  %p685_p3 = scmp.lt.s32.totalorder %s504_s13, %s504_s13 }
 0x150   :  { %p686_p4 = scmp.lt.s32.totalorder %s684_s15, %s680_s14 }
 0x151   :  { %v482_v9 = vrot.slane %v481_v8, 1 }
 0x152   :  { %p687_p5 = por %p686_p4, %p685_p3 }
 0x153   :  { %v483_v10 = vadd.f32 %v482_v9, %v481_v8 }
 0x154   :  { %p688_p6 = pnand %p687_p5, %p681_p2 }
 0x155   :  { %484 = vst.msk [vmem:[#allocation7] sm:$0x1] %vm429_vm2, %v483_v10 }
 0x156   :  { %691 = shalt.err (!%p688_p6)
}
 0x157   :  { %s692_s17 = scalar_lea.hbm %s1008_s6, 16 }
 0x158   :  { %p693_p7 = scmp.ne.s32.totalorder %s1008_s6, %s692_s17  ;;  %p696_p8 = scmp.lt.u32.totalorder %s692_s17, %s1008_s6 }
 0x15a   :  { %p698_p9 = pnand %p696_p8, %p693_p7 }
 0x15c   :  { %701 = shalt.err (!%p698_p9)
}
 0x15d   :  { %506 = dma.vmem_to_hbm [thread:$0]  %s504_s13, 16, %s1008_s6, [#allocation8]  }
 0x15e   :  { %704 = dma.done.wait [#allocation5], 16  }
 0x15f   :  { %705 = vsyncadd [#allocation5], 4294967280 }
 0x160   :  { %706 = dma.done.wait [#allocation8], 16  }
 0x161   :  { %707 = vsyncadd [#allocation8], 4294967280 }
 0x162   :  { %515 = vsyncpa [#allocation4], 1 }
 0x163   :  { %516 = vsyncpa [#allocation5], 1 }
 0x164   :  { %517 = vsyncpa [#allocation8], 1 }

</bundles_post_ra>
